<compile_context>
chip_gen: v6e
topology: v6e:2x2x1
jax: 0.10.0
libtpu: 0.0.40
codegen_flags: <defaults>
</compile_context>

<pallas_src>
import math

import jax
import jax.numpy as jnp
from jax.experimental import pallas as pl
from jax.experimental.pallas import tpu as pltpu


_LANE = 128
_MIB = 1024 * 1024


def _round_up(x, m):
    return (x + m - 1) // m * m


def _divisor_tiles(padded_dim, max_tile):
    """Multiples of 128 that divide `padded_dim` and are <= max_tile, descending."""
    assert padded_dim % _LANE == 0
    units = padded_dim // _LANE
    tiles = [u * _LANE for u in range(1, units + 1)
             if units % u == 0 and u * _LANE <= max_tile]
    if not tiles:
        tiles = [_LANE]
    return sorted(tiles, reverse=True)


def _vmem_cap_bytes():
    """Physical VMEM per TensorCore (generation-aware); conservative fallback."""
    try:
        info = pltpu.get_tpu_info()
        return int(info.vmem_capacity_bytes)
    except Exception:
        return 64 * _MIB  # v7x per-TC size: safe lower bound everywhere


def _vmem_limit(need_bytes, cap_bytes):
    """Scoped-VMEM limit: actual working set + headroom, capped below physical."""
    return int(min(max(need_bytes + 8 * _MIB, 32 * _MIB), 0.9 * cap_bytes))


def _prep(a, rows, cols, dtype):
    """Cast/pad a 2-D array only if needed (skips the extra HBM pass when aligned)."""
    if a.dtype != dtype:
        a = a.astype(dtype)
    r, c = a.shape
    if (r, c) != (rows, cols):
        a = jnp.pad(a, ((0, rows - r), (0, cols - c)))
    return a


# ------------------ stage 1: xw = x @ weight (feature transform) ------------------

def _xw_full_kernel(x_ref, w_ref, xw_ref):
    # W is fully VMEM-resident; one full-K dot per row tile, no accumulator.
    xw_ref[...] = jnp.dot(x_ref[...], w_ref[...],
                          preferred_element_type=jnp.float32).astype(xw_ref.dtype)


def _xw_tiled_kernel(x_ref, w_ref, xw_ref, acc_ref):
    # Fallback for very large feature dims: K-tiled accumulation.
    k = pl.program_id(1)

    @pl.when(k == 0)
    def _():
        acc_ref[...] = jnp.zeros_like(acc_ref)

    acc_ref[...] += jnp.dot(x_ref[...], w_ref[...],
                            preferred_element_type=jnp.float32)

    @pl.when(k == pl.num_programs(1) - 1)
    def _():
        xw_ref[...] = acc_ref[...].astype(xw_ref.dtype)


# --------------- stage 2: out = adj @ xw  (+ bias in finalize) ---------------------

def _make_agg_kernel(xw_resident, tk):
    def kernel(adj_ref, xw_ref, b_ref, out_ref, acc_ref):
        k = pl.program_id(1)

        @pl.when(k == 0)
        def _():
            acc_ref[...] = jnp.zeros_like(acc_ref)

        if xw_resident:
            off = pl.multiple_of(k * tk, _LANE)
            xw_blk = xw_ref[pl.ds(off, tk), :]
        else:
            xw_blk = xw_ref[...]

        acc_ref[...] += jnp.dot(adj_ref[...], xw_blk,
                                preferred_element_type=jnp.float32)

        @pl.when(k == pl.num_programs(1) - 1)
        def _():
            # bias add once per output tile, in f32, after accumulation
            out_ref[...] = (acc_ref[...] + b_ref[...]).astype(out_ref.dtype)

    return kernel


def graph_convolution(x, adj, weight, bias=None, *, compute_dtype=jnp.bfloat16):
    """Pallas implementation of GraphConvolution.forward(x, adj).

    compute_dtype: matmul-operand dtype (default bf16 -> half the HBM bytes on
    the bandwidth-bound aggregation stage).  Accumulation and bias add are
    always float32; output dtype matches x.dtype.  Use jnp.float32 to match the
    PyTorch module within f32 rounding.
    """
    N, num_in = x.shape
    num_in_w, num_out = weight.shape
    assert num_in == num_in_w
    assert adj.shape == (N, N)

    out_dtype = x.dtype
    in_dtype = jnp.dtype(compute_dtype)
    in_item = in_dtype.itemsize
    out_item = jnp.dtype(out_dtype).itemsize

    # 128-aligned padded sizes (no over-padding to the tile size).
    n_p = _round_up(N, _LANE)
    in_p = _round_up(num_in, _LANE)
    out_p = _round_up(num_out, _LANE)

    vmem_cap = _vmem_cap_bytes()
    budget = min(int(0.70 * vmem_cap), 96 * _MIB)   # working-set budget for tiles

    max_t = 2048 if in_item <= 2 else 1024          # bigger tiles for bf16
    # Keep >= 2 row blocks once n_p >= 256 so both v7x TensorCores get work.
    row_cap = n_p // 2 if n_p >= 2 * _LANE else n_p
    tm_cands = _divisor_tiles(n_p, min(max_t, row_cap))

    # Zero-pad / cast inputs only when needed.
    x_p = _prep(x, n_p, in_p, in_dtype)
    w_p = _prep(weight, in_p, out_p, in_dtype)
    if bias is None:
        b_p = jnp.zeros((1, out_p), dtype=jnp.float32)
    else:
        b2 = bias.astype(jnp.float32).reshape(1, num_out)
        b_p = b2 if num_out == out_p else jnp.pad(b2, ((0, 0), (0, out_p - num_out)))

    # ---------------- stage 1: xw = x @ W ----------------
    def s1_full_need(tm):
        return in_item * (2 * tm * in_p + 2 * in_p * out_p + 2 * tm * out_p)

    tm1 = None
    for t in tm_cands:
        if s1_full_need(t) <= budget:
            tm1 = t
            break

    if tm1 is not None:
        # Path A: W fully resident, single full-K dot per row tile (no scratch).
        grid1 = (n_p // tm1,)
        s1_kernel = _xw_full_kernel
        s1_specs = dict(
            in_specs=[pl.BlockSpec((tm1, in_p), lambda i: (i, 0)),
                      pl.BlockSpec((in_p, out_p), lambda i: (0, 0))],
            out_specs=pl.BlockSpec((tm1, out_p), lambda i: (i, 0)),
            scratch_shapes=[],
        )
        sem1 = ("parallel",)
        need1 = s1_full_need(tm1)
        s1_bytes = in_item * (n_p * in_p + in_p * out_p + n_p * out_p)
    else:
        # Path B: K-tiled accumulation for very large feature dims.
        tin_cands = _divisor_tiles(in_p, max_t)

        def s1_tiled_need(tm, t_in):
            return (in_item * (2 * tm * t_in + 2 * t_in * out_p + 2 * tm * out_p)
                    + 4 * tm * out_p)

        chosen = None
        for tmc in tm_cands:
            for tic in tin_cands:
                if s1_tiled_need(tmc, tic) <= budget:
                    if chosen is None or tmc * tic > chosen[0] * chosen[1]:
                        chosen = (tmc, tic)
        if chosen is None:
            chosen = (tm_cands[-1], tin_cands[-1])
        tm1, t_in = chosen
        grid1 = (n_p // tm1, in_p // t_in)
        s1_kernel = _xw_tiled_kernel
        s1_specs = dict(
            in_specs=[pl.BlockSpec((tm1, t_in), lambda i, k: (i, k)),
                      pl.BlockSpec((t_in, out_p), lambda i, k: (k, 0))],
            out_specs=pl.BlockSpec((tm1, out_p), lambda i, k: (i, 0)),
            scratch_shapes=[pltpu.VMEM((tm1, out_p), jnp.float32)],
        )
        sem1 = ("parallel", "arbitrary")
        need1 = s1_tiled_need(tm1, t_in)
        # W is re-streamed once per row tile in this path.
        s1_bytes = in_item * (n_p * in_p
                              + (n_p // tm1) * in_p * out_p
                              + n_p * out_p)

    xw = pl.pallas_call(
        s1_kernel,
        out_shape=jax.ShapeDtypeStruct((n_p, out_p), in_dtype),
        grid_spec=pltpu.PrefetchScalarGridSpec(
            num_scalar_prefetch=0,
            grid=grid1,
            **s1_specs,
        ),
        compiler_params=pltpu.CompilerParams(
            dimension_semantics=sem1,
            vmem_limit_bytes=_vmem_limit(need1, vmem_cap),
        ),
        cost_estimate=pl.CostEstimate(
            flops=2 * n_p * in_p * out_p,
            transcendentals=0,
            bytes_accessed=s1_bytes),
    )(x_p, w_p)

    # ---------------- stage 2: out = adj @ xw (+ bias) ----------------
    adj_p = _prep(adj, n_p, n_p, in_dtype)

    # Keep xw fully VMEM-resident when small; otherwise stream (tk, out_p) blocks.
    xw_resident = (n_p * out_p * in_item) <= 8 * _MIB
    tk_cands = _divisor_tiles(n_p, max_t)

    def s2_need(tm, tk):
        adj_b = 2 * tm * tk * in_item
        xw_b = (2 * n_p * out_p * in_item) if xw_resident else (2 * tk * out_p * in_item)
        return (adj_b + xw_b
                + 2 * tm * out_p * out_item    # output blocks
                + tm * out_p * 4               # f32 accumulator
                + 2 * out_p * 4)               # bias block

    chosen = None
    for tmc in tm_cands:
        for tkc in tk_cands:
            if s2_need(tmc, tkc) <= budget:
                if chosen is None or tmc * tkc > chosen[0] * chosen[1]:
                    chosen = (tmc, tkc)
    if chosen is None:
        chosen = (tm_cands[-1], tk_cands[-1])
    tm2, tk2 = chosen
    need2 = s2_need(tm2, tk2)

    if xw_resident:
        xw_spec = pl.BlockSpec((n_p, out_p), lambda i, k: (0, 0))
        xw_bytes = n_p * out_p * in_item
    else:
        xw_spec = pl.BlockSpec((tk2, out_p), lambda i, k: (k, 0))
        xw_bytes = (n_p // tm2) * n_p * out_p * in_item  # re-read per row tile

    out_full = pl.pallas_call(
        _make_agg_kernel(xw_resident, tk2),
        out_shape=jax.ShapeDtypeStruct((n_p, out_p), out_dtype),
        grid_spec=pltpu.PrefetchScalarGridSpec(
            num_scalar_prefetch=0,
            grid=(n_p // tm2, n_p // tk2),
            in_specs=[
                pl.BlockSpec((tm2, tk2), lambda i, k: (i, k)),
                xw_spec,
                pl.BlockSpec((1, out_p), lambda i, k: (0, 0)),
            ],
            out_specs=pl.BlockSpec((tm2, out_p), lambda i, k: (i, 0)),
            scratch_shapes=[pltpu.VMEM((tm2, out_p), jnp.float32)],
        ),
        compiler_params=pltpu.CompilerParams(
            dimension_semantics=("parallel", "arbitrary"),
            vmem_limit_bytes=_vmem_limit(need2, vmem_cap),
        ),
        cost_estimate=pl.CostEstimate(
            flops=2 * n_p * n_p * out_p,
            transcendentals=0,
            bytes_accessed=(n_p * n_p * in_item + xw_bytes
                            + n_p * out_p * out_item + out_p * 4)),
    )(adj_p, xw, b_p)

    if n_p == N and out_p == num_out:
        return out_full
    return out_full[:N, :num_out]


def init_params(key, num_in, num_out, bias=False):
    """Deterministic parameter init roughly matching the PyTorch module
    (kaiming normal, std = sqrt(2 / fan_in))."""
    wkey, _ = jax.random.split(key)
    std = math.sqrt(2.0 / num_in)
    weight = jax.random.normal(wkey, (num_in, num_out), dtype=jnp.float32) * std
    b = jnp.zeros((num_out,), dtype=jnp.float32) if bias else None
    return weight, b


if __name__ == "__main__":
    key = jax.random.PRNGKey(0)
    k_x, k_adj, k_p = jax.random.split(key, 3)

    # small shapes: N=16 nodes, num_in=32, num_out=32
    N, num_in, num_out = 16, 32, 32

    x = jax.random.normal(k_x, (N, num_in), dtype=jnp.float32)
    # simple symmetric row-normalized adjacency
    a = jax.random.uniform(k_adj, (N, N), dtype=jnp.float32)
    a = (a + a.T) * 0.5 + jnp.eye(N, dtype=jnp.float32)
    adj = a / jnp.sum(a, axis=1, keepdims=True)

    weight, bias = init_params(k_p, num_in, num_out, bias=True)
    bias = bias + 0.1  # make the bias non-trivial

    ref_nb = (adj @ x) @ weight
    ref_b = ref_nb + bias

    # ---- exact-precision path (f32 operands, f32 accumulate), no bias ----
    out_f32 = jax.block_until_ready(
        graph_convolution(x, adj, weight, None, compute_dtype=jnp.float32))
    assert out_f32.shape == (N, num_out)
    assert jnp.allclose(out_f32, ref_nb, atol=1e-5, rtol=1e-5), \
        "mismatch vs reference (f32, no bias)"

    # ---- exact-precision path, with bias ----
    out_f32_b = jax.block_until_ready(
        graph_convolution(x, adj, weight, bias, compute_dtype=jnp.float32))
    assert jnp.allclose(out_f32_b, ref_b, atol=1e-5, rtol=1e-5), \
        "mismatch vs reference (f32, bias)"

    # ---- default fast path: bf16 operands, f32 accumulation (looser tolerance) ----
    out_bf16 = jax.block_until_ready(graph_convolution(x, adj, weight, bias))
    assert out_bf16.shape == (N, num_out)
    assert out_bf16.dtype == x.dtype
    assert jnp.allclose(out_bf16, ref_b, atol=5e-2, rtol=5e-2), \
        "mismatch vs reference (bf16 fast path)"

    print("KERNEL_OK")
</pallas_src>

<mosaic_0001>
module attributes {stable_mosaic.version = 11 : i64} {
  func.func @_xw_full_kernel(%arg0: i32, %arg1: memref<128x128xf32, #tpu.memory_space<vmem>>, %arg2: memref<128x128xf32, #tpu.memory_space<vmem>>, %arg3: memref<128x128xf32, #tpu.memory_space<vmem>>) attributes {dimension_semantics = [#tpu.dimension_semantics<parallel>], iteration_bounds = array<i64: 1>, scalar_prefetch = 0 : i64, scratch_operands = 0 : i64, tpu.core_type = #tpu.core_type<tc>, window_params = [{transform_indices = @transform_0, window_bounds = array<i64: 128, 128>}, {pipeline_mode = #tpu.pipeline_mode<synchronous>, transform_indices = @transform_1, window_bounds = array<i64: 128, 128>}, {transform_indices = @transform_2, window_bounds = array<i64: 128, 128>}]} {
    %c0 = arith.constant 0 : index
    %c0_0 = arith.constant 0 : index
    %0 = vector.load %arg1[%c0, %c0_0] : memref<128x128xf32, #tpu.memory_space<vmem>>, vector<128x128xf32>
    %c0_1 = arith.constant 0 : index
    %c0_2 = arith.constant 0 : index
    %1 = vector.load %arg2[%c0_1, %c0_2] : memref<128x128xf32, #tpu.memory_space<vmem>>, vector<128x128xf32>
    %cst = arith.constant dense<0.000000e+00> : vector<128x128xf32>
    %2 = tpu.matmul %0, %1, %cst {dimension_numbers = #tpu.dot_dimension_numbers<[1], [0], [0], [1], [0, 0, 1, 1], [], []>} : vector<128x128xf32>, vector<128x128xf32>, vector<128x128xf32> -> vector<128x128xf32>
    %c0_3 = arith.constant 0 : index
    %c0_4 = arith.constant 0 : index
    %3 = vector.load %arg3[%c0_3, %c0_4] : memref<128x128xf32, #tpu.memory_space<vmem>>, vector<128x128xf32>
    tpu.vector_store %arg3[%c0_3, %c0_4], %2 {strides = array<i32>} : memref<128x128xf32, #tpu.memory_space<vmem>>, vector<128x128xf32>,
    return
  }
  func.func @transform_0(%arg0: i32) -> (i32, i32) {
    %c0_i32 = arith.constant 0 : i32
    %c0_i32_0 = arith.constant 0 : i32
    return %arg0, %c0_i32 : i32, i32
  }
  func.func @transform_1(%arg0: i32) -> (i32, i32) {
    %c0_i32 = arith.constant 0 : i32
    %c0_i32_0 = arith.constant 0 : i32
    %c0_i32_1 = arith.constant 0 : i32
    return %c0_i32, %c0_i32_0 : i32, i32
  }
  func.func @transform_2(%arg0: i32) -> (i32, i32) {
    %c0_i32 = arith.constant 0 : i32
    %c0_i32_0 = arith.constant 0 : i32
    return %arg0, %c0_i32 : i32, i32
  }
}

</mosaic_0001>

<bundles_post_ra>
// kernel: tpu_custom_call.1
= control target key start
LH: loop header
LB: loop body
LE: loop exit
PB: predicated region body
PF: predicated region fallthrough
CT: control target
= control target key end

     0   :  { %7 = vsyncpa [#allocation3], 0  ;;  %s480_s0 = inlined_call_operand.hbm [shape: f32[128,128], index: 0, kind: input, shape index: {}]   ;;  %s481_s1 = inlined_call_operand.hbm [shape: f32[128,128], index: 1, kind: input, shape index: {}]   ;;  %s482_s2 = inlined_call_operand.hbm [shape: f32[128,128], index: 2, kind: output, shape index: {}]  }
   0x1   :  { %8 = vsyncpa [#allocation6], 0 }
   0x2   :  { %9 = vsyncpa [#allocation4], 0  ;;  %s442_s9 = smov [#allocation2]  }
   0x3   :  { %s15_s10 = sshll.u32 %s442_s9, 4  ;;  %s16_s10 = int_to_ptr.vmem [resolvable:$true] %s15_s10 }
   0x4   :  { %s384_s11 = scalar_lea.vmem %s16_s10, 2048  ;;  %p389_p1 = scmp.lt.s32.totalorder %s16_s10, %s16_s10 }
   0x5   :  { %p385_p0 = scmp.ne.s32.totalorder %s16_s10, %s384_s11  ;;  %p390_p2 = scmp.lt.s32.totalorder %s384_s11, %s384_s11 }
   0x7   :  { %p391_p3 = por %p390_p2, %p389_p1 }
   0x9   :  { %p392_p4 = pnand %p391_p3, %p385_p0 }
   0xb   :  { %395 = shalt.err (!%p392_p4)
}
   0xc   :  { %s443_s12 = smov 128   ;;  %s444_s13 = smov 8  }
   0xd   :  { %21 = dma.hbm_to_vmem [thread:$0]  %s480_s0, 2048, %s16_s10, [#allocation3], %s443_s12, %s443_s12, %s444_s13  }
   0xe   :  { %s445_s16 = smov [#allocation5]  }
   0xf   :  { %s27_s17 = sshll.u32 %s445_s16, 4  ;;  %s28_s17 = int_to_ptr.vmem [resolvable:$true] %s27_s17 }
  0x10   :  { %s404_s18 = scalar_lea.vmem %s28_s17, 2048  ;;  %p409_p6 = scmp.lt.s32.totalorder %s28_s17, %s28_s17 }
  0x11   :  { %p405_p5 = scmp.ne.s32.totalorder %s28_s17, %s404_s18  ;;  %p410_p7 = scmp.lt.s32.totalorder %s404_s18, %s404_s18 }
  0x13   :  { %p411_p8 = por %p410_p7, %p409_p6 }
  0x15   :  { %p412_p9 = pnand %p411_p8, %p405_p5 }
  0x17   :  { %415 = shalt.err (!%p412_p9)
}
  0x18   :  { %33 = dma.hbm_to_vmem [thread:$0]  %s481_s1, 2048, %s28_s17, [#allocation6], %s443_s12, %s443_s12, %s444_s13  }
  0x19   :  { %436 = dma.done.wait [#allocation3], 2048  }
  0x1a   :  { %437 = vsyncadd [#allocation3], 4294965248 }
  0x1b   :  { %438 = dma.done.wait [#allocation6], 2048  }
  0x1c   :  { %439 = vsyncadd [#allocation6], 4294965248  ;;  %v71_v0 = vld [vmem:[#allocation5 + $0x78] sm:$0xff]  ;;  %v70_v1 = vld [vmem:[#allocation5 + $0x70] sm:$0xff]  ;;  %s446_s0 = smov [#allocation7]  }
  0x1d   :  { %283 = vmatprep.subr.mxu0 %v71_v0  ;;  %339 = vmatprep.subr.mxu1 %v71_v0  ;;  %v69_v2 = vld [vmem:[#allocation5 + $0x68] sm:$0xff]  ;;  %v68_v3 = vld [vmem:[#allocation5 + $0x60] sm:$0xff]  ;;  %v67_v4 = vld [vmem:[#allocation5 + $0x58] sm:$0xff]  ;;  %s238_s1 = sshll.u32 %s446_s0, 4  ;;  %s239_s1 = int_to_ptr.vmem [resolvable:$true] %s238_s1 }
  0x1e   :  { %284 = vmatpush3.msra.mxu0 %v71_v0  ;;  %355 = vmatpush3.msra.mxu1 %v71_v0  ;;  %v66_v5 = vld [vmem:[#allocation5 + $0x50] sm:$0xff]  ;;  %v65_v6 = vld [vmem:[#allocation5 + $0x48] sm:$0xff]  ;;  %v64_v7 = vld [vmem:[#allocation5 + $0x40] sm:$0xff]  ;;  %s416_s21 = scalar_lea.vmem %s239_s1, 2048  ;;  %p421_p11 = scmp.lt.s32.totalorder %s239_s1, %s239_s1 }
  0x1f   :  { %285 = vmatprep.subr.mxu0 %v70_v1  ;;  %340 = vmatprep.subr.mxu1 %v70_v1  ;;  %v63_v8 = vld [vmem:[#allocation5 + $0x38] sm:$0xff]  ;;  %v62_v9 = vld [vmem:[#allocation5 + $0x30] sm:$0xff]  ;;  %v61_v10 = vld [vmem:[#allocation5 + $0x28] sm:$0xff]  ;;  %p417_p10 = scmp.ne.s32.totalorder %s239_s1, %s416_s21  ;;  %p422_p12 = scmp.lt.s32.totalorder %s416_s21, %s416_s21 }
  0x20   :  { %286 = vmatpush3.msra.mxu0 %v70_v1  ;;  %356 = vmatpush3.msra.mxu1 %v70_v1  ;;  %v60_v11 = vld [vmem:[#allocation5 + $0x20] sm:$0xff]  ;;  %v59_v12 = vld [vmem:[#allocation5 + $0x18] sm:$0xff]  ;;  %v58_v13 = vld [vmem:[#allocation5 + $0x10] sm:$0xff] }
  0x21   :  { %287 = vmatprep.subr.mxu0 %v69_v2  ;;  %341 = vmatprep.subr.mxu1 %v69_v2  ;;  %v57_v14 = vld [vmem:[#allocation5 + $0x8] sm:$0xff]  ;;  %v56_v15 = vld [vmem:[#allocation5] sm:$0xff]  ;;  %v42_v20 = vld [vmem:[#allocation2 + $0x10] sm:$0xff]  ;;  %p423_p13 = por %p422_p12, %p421_p11 }
  0x22   :  { %288 = vmatpush3.msra.mxu0 %v69_v2  ;;  %357 = vmatpush3.msra.mxu1 %v69_v2  ;;  %v40_v16 = vld [vmem:[#allocation2] sm:$0xff]  ;;  %v41_v18 = vld [vmem:[#allocation2 + $0x8] sm:$0xff]  ;;  %v50_v21 = vld [vmem:[#allocation2 + $0x50] sm:$0xff] }
  0x23   :  { %289 = vmatprep.subr.mxu0 %v68_v3  ;;  %342 = vmatprep.subr.mxu1 %v68_v3  ;;  %v48_v17 = vld [vmem:[#allocation2 + $0x40] sm:$0xff]  ;;  %v49_v19 = vld [vmem:[#allocation2 + $0x48] sm:$0xff]  ;;  %v43_v22 = vld [vmem:[#allocation2 + $0x18] sm:$0xff]  ;;  %p424_p0 = pnand %p423_p13, %p417_p10 }
  0x24   :  { %290 = vmatpush3.msra.mxu0 %v68_v3  ;;  %358 = vmatpush3.msra.mxu1 %v68_v3  ;;  %v51_v23 = vld [vmem:[#allocation2 + $0x58] sm:$0xff]  ;;  %v44_v24 = vld [vmem:[#allocation2 + $0x20] sm:$0xff]  ;;  %v45_v26 = vld [vmem:[#allocation2 + $0x28] sm:$0xff] }
  0x25   :  { %291 = vmatprep.subr.mxu0 %v67_v4  ;;  %343 = vmatprep.subr.mxu1 %v67_v4  ;;  %v52_v25 = vld [vmem:[#allocation2 + $0x60] sm:$0xff]  ;;  %v53_v27 = vld [vmem:[#allocation2 + $0x68] sm:$0xff]  ;;  %v46_v28 = vld [vmem:[#allocation2 + $0x30] sm:$0xff] }
  0x26   :  { %292 = vmatpush3.msra.mxu0 %v67_v4  ;;  %359 = vmatpush3.msra.mxu1 %v67_v4  ;;  %v54_v29 = vld [vmem:[#allocation2 + $0x70] sm:$0xff]  ;;  %v47_v30 = vld [vmem:[#allocation2 + $0x38] sm:$0xff] }
  0x27   :  { %293 = vmatprep.subr.mxu0 %v66_v5  ;;  %344 = vmatprep.subr.mxu1 %v66_v5  ;;  %v55_v31 = vld [vmem:[#allocation2 + $0x78] sm:$0xff] }
  0x28   :  { %294 = vmatpush3.msra.mxu0 %v66_v5  ;;  %360 = vmatpush3.msra.mxu1 %v66_v5 }
  0x29   :  { %295 = vmatprep.subr.mxu0 %v65_v6  ;;  %345 = vmatprep.subr.mxu1 %v65_v6 }
  0x2a   :  { %296 = vmatpush3.msra.mxu0 %v65_v6  ;;  %361 = vmatpush3.msra.mxu1 %v65_v6 }
  0x2b   :  { %297 = vmatprep.subr.mxu0 %v64_v7  ;;  %346 = vmatprep.subr.mxu1 %v64_v7 }
  0x2c   :  { %298 = vmatpush3.msra.mxu0 %v64_v7  ;;  %362 = vmatpush3.msra.mxu1 %v64_v7 }
  0x2d   :  { %299 = vmatprep.subr.mxu0 %v63_v8  ;;  %347 = vmatprep.subr.mxu1 %v63_v8 }
  0x2e   :  { %300 = vmatpush3.msra.mxu0 %v63_v8  ;;  %363 = vmatpush3.msra.mxu1 %v63_v8 }
  0x2f   :  { %301 = vmatprep.subr.mxu0 %v62_v9  ;;  %348 = vmatprep.subr.mxu1 %v62_v9 }
  0x30   :  { %302 = vmatpush3.msra.mxu0 %v62_v9  ;;  %364 = vmatpush3.msra.mxu1 %v62_v9 }
  0x31   :  { %303 = vmatprep.subr.mxu0 %v61_v10  ;;  %349 = vmatprep.subr.mxu1 %v61_v10 }
  0x32   :  { %304 = vmatpush3.msra.mxu0 %v61_v10  ;;  %365 = vmatpush3.msra.mxu1 %v61_v10 }
  0x33   :  { %305 = vmatprep.subr.mxu0 %v60_v11  ;;  %350 = vmatprep.subr.mxu1 %v60_v11 }
  0x34   :  { %306 = vmatpush3.msra.mxu0 %v60_v11  ;;  %366 = vmatpush3.msra.mxu1 %v60_v11 }
  0x35   :  { %307 = vmatprep.subr.mxu0 %v59_v12  ;;  %351 = vmatprep.subr.mxu1 %v59_v12 }
  0x36   :  { %308 = vmatpush3.msra.mxu0 %v59_v12  ;;  %367 = vmatpush3.msra.mxu1 %v59_v12 }
  0x37   :  { %309 = vmatprep.subr.mxu0 %v58_v13  ;;  %352 = vmatprep.subr.mxu1 %v58_v13 }
  0x38   :  { %310 = vmatpush3.msra.mxu0 %v58_v13  ;;  %368 = vmatpush3.msra.mxu1 %v58_v13 }
  0x39   :  { %311 = vmatprep.subr.mxu0 %v57_v14  ;;  %353 = vmatprep.subr.mxu1 %v57_v14 }
  0x3a   :  { %312 = vmatpush3.msra.mxu0 %v57_v14  ;;  %369 = vmatpush3.msra.mxu1 %v57_v14 }
  0x3b   :  { %313 = vmatprep.subr.mxu0 %v56_v15  ;;  %354 = vmatprep.subr.mxu1 %v56_v15 }
  0x3c   :  { %314 = vmatpush3.msra.mxu0 %v56_v15  ;;  %370 = vmatpush3.msra.mxu1 %v56_v15 }
  0x3d   :  { %315 = vmatprep.mubr.f32.mxu0 %v40_v16  ;;  %327 = vmatprep.mubr.f32.mxu1 %v48_v17 }
  0x3e   :  { %316 = vmatmul.mubr.f32.vlgmr.msra.gmra.mxu0 %v41_v18  ;;  %328 = vmatmul.mubr.f32.vlgmr.msra.gmra.mxu1 %v49_v19 }
  0x3f   :  { %318 = vmatprep.mubr.f32.mxu0 %v42_v20  ;;  %330 = vmatprep.mubr.f32.mxu1 %v50_v21 }
  0x42   :  { %319 = vmatmul.mubr.f32.gmra.mxu0 %v43_v22  ;;  %331 = vmatmul.mubr.f32.gmra.mxu1 %v51_v23 }
  0x43   :  { %321 = vmatprep.mubr.f32.mxu0 %v44_v24  ;;  %333 = vmatprep.mubr.f32.mxu1 %v52_v25 }
  0x46   :  { %322 = vmatmul.mubr.f32.gmra.mxu0 %v45_v26  ;;  %334 = vmatmul.mubr.f32.gmra.mxu1 %v53_v27 }
  0x47   :  { %324 = vmatprep.mubr.f32.mxu0 %v46_v28  ;;  %336 = vmatprep.mubr.f32.mxu1 %v54_v29 }
  0x4a   :  { %325 = vmatmul.mubr.f32.gmra.mxu0 %v47_v30  ;;  %337 = vmatmul.mubr.f32.gmra.mxu1 %v55_v31 }
  0xfe   :  { %v317_v32 = vpop.f32.mrf.mxu0  ;;  %v329_v33 = vpop.f32.mrf.mxu1 }
  0xff   :  { %218 = vst [vmem:[#allocation7 + $0x8] sm:$0xff] %v317_v32  ;;  %226 = vst [vmem:[#allocation7 + $0x48] sm:$0xff] %v329_v33 }
 0x100   :  { %v138_v34 = vpop.f32.mrf.mxu0  ;;  %v178_v35 = vpop.f32.mrf.mxu1 }
 0x101   :  { %217 = vst [vmem:[#allocation7] sm:$0xff] %v138_v34  ;;  %225 = vst [vmem:[#allocation7 + $0x40] sm:$0xff] %v178_v35 }
 0x102   :  { %v320_v36 = vpop.f32.mrf.mxu0  ;;  %v332_v37 = vpop.f32.mrf.mxu1 }
 0x103   :  { %220 = vst [vmem:[#allocation7 + $0x18] sm:$0xff] %v320_v36  ;;  %228 = vst [vmem:[#allocation7 + $0x58] sm:$0xff] %v332_v37 }
 0x104   :  { %v148_v38 = vpop.f32.mrf.mxu0  ;;  %v188_v39 = vpop.f32.mrf.mxu1 }
 0x105   :  { %219 = vst [vmem:[#allocation7 + $0x10] sm:$0xff] %v148_v38  ;;  %227 = vst [vmem:[#allocation7 + $0x50] sm:$0xff] %v188_v39 }
 0x106   :  { %v323_v40 = vpop.f32.mrf.mxu0  ;;  %v335_v41 = vpop.f32.mrf.mxu1 }
 0x107   :  { %222 = vst [vmem:[#allocation7 + $0x28] sm:$0xff] %v323_v40  ;;  %230 = vst [vmem:[#allocation7 + $0x68] sm:$0xff] %v335_v41 }
 0x108   :  { %v158_v42 = vpop.f32.mrf.mxu0  ;;  %v198_v43 = vpop.f32.mrf.mxu1 }
 0x109   :  { %221 = vst [vmem:[#allocation7 + $0x20] sm:$0xff] %v158_v42  ;;  %229 = vst [vmem:[#allocation7 + $0x60] sm:$0xff] %v198_v43 }
 0x10a   :  { %v326_v44 = vpop.f32.mrf.mxu0  ;;  %v338_v45 = vpop.f32.mrf.mxu1 }
 0x10b   :  { %224 = vst [vmem:[#allocation7 + $0x38] sm:$0xff] %v326_v44  ;;  %232 = vst [vmem:[#allocation7 + $0x78] sm:$0xff] %v338_v45 }
 0x10c   :  { %v168_v46 = vpop.f32.mrf.mxu0  ;;  %v208_v47 = vpop.f32.mrf.mxu1 }
 0x10d   :  { %223 = vst [vmem:[#allocation7 + $0x30] sm:$0xff] %v168_v46  ;;  %231 = vst [vmem:[#allocation7 + $0x70] sm:$0xff] %v208_v47 }
 0x10e   :  { %427 = shalt.err (!%p424_p0)
}
 0x10f   :  { %244 = dma.vmem_to_hbm [thread:$0]  %s239_s1, 2048, %s482_s2, [#allocation4], %s443_s12, %s443_s12, %s444_s13  }
 0x110   :  { %440 = dma.done.wait [#allocation4], 2048  }
 0x111   :  { %441 = vsyncadd [#allocation4], 4294965248 }
 0x112   :  { %248 = vsyncpa [#allocation3], 1 }
 0x113   :  { %249 = vsyncpa [#allocation6], 1 }
 0x114   :  { %250 = vsyncpa [#allocation4], 1 }

</bundles_post_ra>
